<compile_context>
chip_gen: v7x
topology: tpu7x:2x2x1
jax: 0.10.0
libtpu: 0.0.40
codegen_flags: <defaults>
</compile_context>

<pallas_src>
import functools

import jax
import jax.numpy as jnp
from jax.experimental import pallas as pl
from jax.experimental.pallas import tpu as pltpu

LANES = 128           # lane width of a vreg
MAX_TILE_SUB = 4096   # max sublane rows per grid tile: 4096*128*4B = 2 MiB/buf


def mlp_kernel(p_ref, x_ref, o_ref, *, n_hidden, compute_dtype):
    # x_ref: (tile_sub, 128) lane-dense f32 block of samples (n_feature == 1).
    # p_ref: (2 + 2H,) f32 SMEM array = [A, B, d_0..d_{H-1}, e_0..e_{H-1}].
    # y = A*x + B + sum_h d_h * |x + e_h|   (== relu MLP; see wrapper).
    x = x_ref[...].astype(compute_dtype)
    a = p_ref[0].astype(compute_dtype)
    b = p_ref[1].astype(compute_dtype)
    acc = x * a + b
    for h in range(n_hidden):                    # static, fully unrolled
        d = p_ref[2 + h].astype(compute_dtype)
        e = p_ref[2 + n_hidden + h].astype(compute_dtype)
        acc = acc + d * jnp.abs(x + e)
    o_ref[...] = acc.astype(o_ref.dtype)


def default_compute_dtype():
    """bf16 VALU exists on v6e / v7x; keep f32 on v5e/v5p/v4 and older."""
    try:
        kind = jax.devices()[0].device_kind.lower()
    except Exception:
        return jnp.float32
    if ("v6" in kind) or ("v7" in kind) or ("7x" in kind):
        return jnp.bfloat16
    return jnp.float32


def net_forward(x, w1, b1, w2, b2, compute_dtype=jnp.float32):
    """y = relu(x @ W1 + b1) @ W2 + b2 for x:[N,1], W1:[1,H], W2:[H,1]."""
    if w1.shape[0] != 1 or w2.shape[1] != 1:
        raise ValueError("kernel is specialized to n_feature == n_output == 1")
    n = x.shape[0]
    n_hidden = w1.shape[1]
    n_out = w2.shape[1]
    x = x.astype(jnp.float32)

    # ---- O(H) scalar precompute (done once, outside the kernel) ----------
    w1f = w1.reshape(-1).astype(jnp.float32)
    b1f = b1.reshape(-1).astype(jnp.float32)
    w2f = w2.reshape(-1).astype(jnp.float32)
    b2s = b2.reshape(-1)[0].astype(jnp.float32)
    nz = w1f != 0.0
    a_c = 0.5 * jnp.sum(w2f * w1f)
    b_c = (b2s + 0.5 * jnp.sum(w2f * b1f)
           + 0.5 * jnp.sum(jnp.where(nz, 0.0, w2f * jnp.abs(b1f))))
    d_c = jnp.where(nz, 0.5 * w2f * jnp.abs(w1f), 0.0)
    e_c = jnp.where(nz, b1f / jnp.where(nz, w1f, 1.0), 0.0)
    params = jnp.concatenate([jnp.stack([a_c, b_c]), d_c, e_c])   # (2+2H,)

    # ---- lane-dense slab tiling ------------------------------------------
    rows_needed = pl.cdiv(n, LANES)
    rows_min = pl.cdiv(rows_needed, 8) * 8
    # >= 2 grid steps whenever there is enough work (feeds both v7x TCs).
    tile_sub = min(MAX_TILE_SUB, max(8, pl.cdiv(rows_min, 16) * 8))
    rows_padded = pl.cdiv(rows_needed, tile_sub) * tile_sub
    num_tiles = rows_padded // tile_sub
    n_padded = rows_padded * LANES

    if n_padded == n:        # fast path: no pad / no slice HBM round trips
        x_slab = x.reshape(rows_padded, LANES)
    else:
        x_slab = jnp.pad(x.reshape(-1), (0, n_padded - n)).reshape(
            rows_padded, LANES)

    smem_spec = pl.BlockSpec(memory_space=pltpu.MemorySpace.SMEM)
    tile_spec = pl.BlockSpec((tile_sub, LANES), lambda i: (i, 0))

    out_slab = pl.pallas_call(
        functools.partial(mlp_kernel, n_hidden=n_hidden,
                          compute_dtype=compute_dtype),
        out_shape=jax.ShapeDtypeStruct((rows_padded, LANES), jnp.float32),
        grid=(num_tiles,),
        in_specs=[smem_spec, tile_spec],
        out_specs=tile_spec,
        compiler_params=pltpu.CompilerParams(
            dimension_semantics=("parallel",)),
    )(params, x_slab)

    if n_padded == n:
        return out_slab.reshape(n, n_out)
    # Padded tail lanes hold garbage (y(0) != 0); slice before returning.
    return out_slab.reshape(-1)[:n].reshape(n, n_out)


def init_params(key, n_feature, n_hidden, n_output):
    # Deterministic init mimicking torch.nn.Linear's U(-1/sqrt(fan_in), ...).
    k1, k2, k3, k4 = jax.random.split(key, 4)
    lim1 = 1.0 / jnp.sqrt(jnp.float32(n_feature))
    lim2 = 1.0 / jnp.sqrt(jnp.float32(n_hidden))
    w1 = jax.random.uniform(k1, (n_feature, n_hidden), jnp.float32, -lim1, lim1)
    b1 = jax.random.uniform(k2, (1, n_hidden), jnp.float32, -lim1, lim1)
    w2 = jax.random.uniform(k3, (n_hidden, n_output), jnp.float32, -lim2, lim2)
    b2 = jax.random.uniform(k4, (1, n_output), jnp.float32, -lim2, lim2)
    return w1, b1, w2, b2


if __name__ == "__main__":
    # Shapes from the reference script: x = unsqueeze(linspace(-1, 1, 100), 1)
    # and Net(n_feature=1, n_hidden=10, n_output=1).
    n_feature, n_hidden, n_output = 1, 10, 1
    N = 100

    x = jnp.linspace(-1.0, 1.0, N, dtype=jnp.float32).reshape(N, 1)
    key = jax.random.PRNGKey(0)
    w1, b1, w2, b2 = init_params(key, n_feature, n_hidden, n_output)

    compute_dtype = default_compute_dtype()
    fwd = jax.jit(functools.partial(net_forward, compute_dtype=compute_dtype))
    out = jax.block_until_ready(fwd(x, w1, b1, w2, b2))

    # Pure-JAX reference check of the forward semantics.
    ref = jnp.maximum(x @ w1 + b1, 0.0) @ w2 + b2
    assert out.shape == (N, n_output)
    if compute_dtype == jnp.bfloat16:
        tol = dict(atol=6e-2, rtol=6e-2)   # bf16 compute path on v6e/v7x
    else:
        tol = dict(atol=1e-5, rtol=1e-5)   # f32 path (v5e and older)
    assert jnp.allclose(out, ref, **tol), float(jnp.max(jnp.abs(out - ref)))

    print("KERNEL_OK")
</pallas_src>

<mosaic_0001>
module attributes {stable_mosaic.version = 11 : i64} {
  func.func @mlp_kernel(%arg0: i32, %arg1: memref<22xf32, #tpu.memory_space<smem>>, %arg2: memref<8x128xf32, #tpu.memory_space<vmem>>, %arg3: memref<8x128xf32, #tpu.memory_space<vmem>>) attributes {dimension_semantics = [#tpu.dimension_semantics<parallel>], iteration_bounds = array<i64: 1>, scalar_prefetch = 0 : i64, scratch_operands = 0 : i64, tpu.core_type = #tpu.core_type<tc>, window_params = [{transform_indices = @transform_0, window_bounds = array<i64: 22>}, {transform_indices = @transform_1, window_bounds = array<i64: 8, 128>}, {transform_indices = @transform_2, window_bounds = array<i64: 8, 128>}]} {
    %c0 = arith.constant 0 : index
    %c0_0 = arith.constant 0 : index
    %0 = vector.load %arg2[%c0, %c0_0] : memref<8x128xf32, #tpu.memory_space<vmem>>, vector<8x128xf32>
    %c0_1 = arith.constant 0 : index
    %1 = memref.load %arg1[%c0_1] : memref<22xf32, #tpu.memory_space<smem>>
    %c1 = arith.constant 1 : index
    %2 = memref.load %arg1[%c1] : memref<22xf32, #tpu.memory_space<smem>>
    %3 = vector.broadcast %1 : f32 to vector<8x128xf32>
    %4 = arith.mulf %0, %3 : vector<8x128xf32>
    %5 = vector.broadcast %2 : f32 to vector<8x128xf32>
    %6 = arith.addf %4, %5 : vector<8x128xf32>
    %c2 = arith.constant 2 : index
    %7 = memref.load %arg1[%c2] : memref<22xf32, #tpu.memory_space<smem>>
    %c12 = arith.constant 12 : index
    %8 = memref.load %arg1[%c12] : memref<22xf32, #tpu.memory_space<smem>>
    %9 = vector.broadcast %8 : f32 to vector<8x128xf32>
    %10 = arith.addf %0, %9 : vector<8x128xf32>
    %11 = math.absf %10 : vector<8x128xf32>
    %12 = vector.broadcast %7 : f32 to vector<8x128xf32>
    %13 = arith.mulf %12, %11 : vector<8x128xf32>
    %14 = arith.addf %6, %13 : vector<8x128xf32>
    %c3 = arith.constant 3 : index
    %15 = memref.load %arg1[%c3] : memref<22xf32, #tpu.memory_space<smem>>
    %c13 = arith.constant 13 : index
    %16 = memref.load %arg1[%c13] : memref<22xf32, #tpu.memory_space<smem>>
    %17 = vector.broadcast %16 : f32 to vector<8x128xf32>
    %18 = arith.addf %0, %17 : vector<8x128xf32>
    %19 = math.absf %18 : vector<8x128xf32>
    %20 = vector.broadcast %15 : f32 to vector<8x128xf32>
    %21 = arith.mulf %20, %19 : vector<8x128xf32>
    %22 = arith.addf %14, %21 : vector<8x128xf32>
    %c4 = arith.constant 4 : index
    %23 = memref.load %arg1[%c4] : memref<22xf32, #tpu.memory_space<smem>>
    %c14 = arith.constant 14 : index
    %24 = memref.load %arg1[%c14] : memref<22xf32, #tpu.memory_space<smem>>
    %25 = vector.broadcast %24 : f32 to vector<8x128xf32>
    %26 = arith.addf %0, %25 : vector<8x128xf32>
    %27 = math.absf %26 : vector<8x128xf32>
    %28 = vector.broadcast %23 : f32 to vector<8x128xf32>
    %29 = arith.mulf %28, %27 : vector<8x128xf32>
    %30 = arith.addf %22, %29 : vector<8x128xf32>
    %c5 = arith.constant 5 : index
    %31 = memref.load %arg1[%c5] : memref<22xf32, #tpu.memory_space<smem>>
    %c15 = arith.constant 15 : index
    %32 = memref.load %arg1[%c15] : memref<22xf32, #tpu.memory_space<smem>>
    %33 = vector.broadcast %32 : f32 to vector<8x128xf32>
    %34 = arith.addf %0, %33 : vector<8x128xf32>
    %35 = math.absf %34 : vector<8x128xf32>
    %36 = vector.broadcast %31 : f32 to vector<8x128xf32>
    %37 = arith.mulf %36, %35 : vector<8x128xf32>
    %38 = arith.addf %30, %37 : vector<8x128xf32>
    %c6 = arith.constant 6 : index
    %39 = memref.load %arg1[%c6] : memref<22xf32, #tpu.memory_space<smem>>
    %c16 = arith.constant 16 : index
    %40 = memref.load %arg1[%c16] : memref<22xf32, #tpu.memory_space<smem>>
    %41 = vector.broadcast %40 : f32 to vector<8x128xf32>
    %42 = arith.addf %0, %41 : vector<8x128xf32>
    %43 = math.absf %42 : vector<8x128xf32>
    %44 = vector.broadcast %39 : f32 to vector<8x128xf32>
    %45 = arith.mulf %44, %43 : vector<8x128xf32>
    %46 = arith.addf %38, %45 : vector<8x128xf32>
    %c7 = arith.constant 7 : index
    %47 = memref.load %arg1[%c7] : memref<22xf32, #tpu.memory_space<smem>>
    %c17 = arith.constant 17 : index
    %48 = memref.load %arg1[%c17] : memref<22xf32, #tpu.memory_space<smem>>
    %49 = vector.broadcast %48 : f32 to vector<8x128xf32>
    %50 = arith.addf %0, %49 : vector<8x128xf32>
    %51 = math.absf %50 : vector<8x128xf32>
    %52 = vector.broadcast %47 : f32 to vector<8x128xf32>
    %53 = arith.mulf %52, %51 : vector<8x128xf32>
    %54 = arith.addf %46, %53 : vector<8x128xf32>
    %c8 = arith.constant 8 : index
    %55 = memref.load %arg1[%c8] : memref<22xf32, #tpu.memory_space<smem>>
    %c18 = arith.constant 18 : index
    %56 = memref.load %arg1[%c18] : memref<22xf32, #tpu.memory_space<smem>>
    %57 = vector.broadcast %56 : f32 to vector<8x128xf32>
    %58 = arith.addf %0, %57 : vector<8x128xf32>
    %59 = math.absf %58 : vector<8x128xf32>
    %60 = vector.broadcast %55 : f32 to vector<8x128xf32>
    %61 = arith.mulf %60, %59 : vector<8x128xf32>
    %62 = arith.addf %54, %61 : vector<8x128xf32>
    %c9 = arith.constant 9 : index
    %63 = memref.load %arg1[%c9] : memref<22xf32, #tpu.memory_space<smem>>
    %c19 = arith.constant 19 : index
    %64 = memref.load %arg1[%c19] : memref<22xf32, #tpu.memory_space<smem>>
    %65 = vector.broadcast %64 : f32 to vector<8x128xf32>
    %66 = arith.addf %0, %65 : vector<8x128xf32>
    %67 = math.absf %66 : vector<8x128xf32>
    %68 = vector.broadcast %63 : f32 to vector<8x128xf32>
    %69 = arith.mulf %68, %67 : vector<8x128xf32>
    %70 = arith.addf %62, %69 : vector<8x128xf32>
    %c10 = arith.constant 10 : index
    %71 = memref.load %arg1[%c10] : memref<22xf32, #tpu.memory_space<smem>>
    %c20 = arith.constant 20 : index
    %72 = memref.load %arg1[%c20] : memref<22xf32, #tpu.memory_space<smem>>
    %73 = vector.broadcast %72 : f32 to vector<8x128xf32>
    %74 = arith.addf %0, %73 : vector<8x128xf32>
    %75 = math.absf %74 : vector<8x128xf32>
    %76 = vector.broadcast %71 : f32 to vector<8x128xf32>
    %77 = arith.mulf %76, %75 : vector<8x128xf32>
    %78 = arith.addf %70, %77 : vector<8x128xf32>
    %c11 = arith.constant 11 : index
    %79 = memref.load %arg1[%c11] : memref<22xf32, #tpu.memory_space<smem>>
    %c21 = arith.constant 21 : index
    %80 = memref.load %arg1[%c21] : memref<22xf32, #tpu.memory_space<smem>>
    %81 = vector.broadcast %80 : f32 to vector<8x128xf32>
    %82 = arith.addf %0, %81 : vector<8x128xf32>
    %83 = math.absf %82 : vector<8x128xf32>
    %84 = vector.broadcast %79 : f32 to vector<8x128xf32>
    %85 = arith.mulf %84, %83 : vector<8x128xf32>
    %86 = arith.addf %78, %85 : vector<8x128xf32>
    %c0_2 = arith.constant 0 : index
    %c0_3 = arith.constant 0 : index
    %87 = vector.load %arg3[%c0_2, %c0_3] : memref<8x128xf32, #tpu.memory_space<vmem>>, vector<8x128xf32>
    tpu.vector_store %arg3[%c0_2, %c0_3], %86 {strides = array<i32>} : memref<8x128xf32, #tpu.memory_space<vmem>>, vector<8x128xf32>,
    return
  }
  func.func @transform_0(%arg0: i32) -> i32 {
    %c0_i32 = arith.constant 0 : i32
    %c0_i32_0 = arith.constant 0 : i32
    return %c0_i32 : i32
  }
  func.func @transform_1(%arg0: i32) -> (i32, i32) {
    %c0_i32 = arith.constant 0 : i32
    %c0_i32_0 = arith.constant 0 : i32
    return %arg0, %c0_i32 : i32, i32
  }
  func.func @transform_2(%arg0: i32) -> (i32, i32) {
    %c0_i32 = arith.constant 0 : i32
    %c0_i32_0 = arith.constant 0 : i32
    return %arg0, %c0_i32 : i32, i32
  }
}

</mosaic_0001>

<bundles_post_ra>
// kernel: net_forward.1
= control target key start
LH: loop header
LB: loop body
LE: loop exit
PB: predicated region body
PF: predicated region fallthrough
CT: control target
= control target key end

     0   :  { %7 = vsyncpa [#allocation3], 0  ;;  %s217_s0 = inlined_call_operand.vmem [shape: f32[22], index: 0, kind: input, shape index: {}]   ;;  %s218_s1 = inlined_call_operand.vmem [shape: f32[8,128], index: 1, kind: input, shape index: {}]   ;;  %s219_s2 = inlined_call_operand.vmem [shape: f32[8,128], index: 2, kind: output, shape index: {}]  }
   0x1   :  { %s14_s11 = sshll.u32 %s217_s0, 4  ;;  %s15_s11 = int_to_ptr.vmem [resolvable:$true] %s14_s11 }
   0x2   :  { %s139_s12 = scalar_lea.vmem %s15_s11, 16  ;;  %p144_p1 = scmp.lt.s32.totalorder %s15_s11, %s15_s11 }
   0x3   :  { %p140_p0 = scmp.ne.s32.totalorder %s15_s11, %s139_s12  ;;  %p145_p2 = scmp.lt.s32.totalorder %s139_s12, %s139_s12 }
   0x5   :  { %p146_p3 = por %p145_p2, %p144_p1 }
   0x7   :  { %p147_p4 = pnand %p146_p3, %p140_p0 }
   0x9   :  { %150 = shalt.err (!%p147_p4)
}
   0xa   :  { %s153_s13 = smov [#allocation2]  }
   0xb   :  { %17 = dma.vmem_to_smem %s15_s11, 16, %s153_s13, [#allocation3]  }
   0xc   :  { %151 = dma.done.wait [#allocation3], 16  }
   0xd   :  { %152 = vsyncadd [#allocation3], 4294967280 }
   0xe   :  { %23 = sfence }
   0xf   :  { %s25_s14 = sld [smem:[#allocation2]]  ;;  %s117_s15 = sld [smem:[#allocation2 + $0x1]]  ;;  %v24_v0 = vld [vmem:[%s218_s1] sm:$0xff] }
  0x10   :  { %s172_s16 = sld [smem:[#allocation2 + $0x2]]  ;;  %s119_s17 = sld [smem:[#allocation2 + $0xc]] }
  0x11   :  { %s174_s18 = sld [smem:[#allocation2 + $0x3]]  ;;  %s121_s0 = sld [smem:[#allocation2 + $0xd]] }
  0x12   :  { %s176_s19 = sld [smem:[#allocation2 + $0x4]]  ;;  %s123_s20 = sld [smem:[#allocation2 + $0xe]] }
  0x13   :  { %s178_s21 = sld [smem:[#allocation2 + $0x5]]  ;;  %s125_s22 = sld [smem:[#allocation2 + $0xf]] }
  0x14   :  { %s183_s25 = sld [smem:[#allocation2 + $0x6]]  ;;  %s127_s26 = sld [smem:[#allocation2 + $0x10]] }
  0x15   :  { %v27_v1 = vstv %s25_s14  ;;  %v29_v2 = vstv %s117_s15  ;;  %s185_s27 = sld [smem:[#allocation2 + $0x11]]  ;;  %s187_s28 = sld [smem:[#allocation2 + $0x12]] }
  0x16   :  { %v28_v3 = vmul.f32 %v27_v1, %v24_v0  ;;  %v33_v4 = vstv %s119_s17  ;;  %v36_v6 = vstv %s172_s16  ;;  %s190_s29 = sld [smem:[#allocation2 + $0x13]]  ;;  %s193_s1 = sld [smem:[#allocation2 + $0x7]] }
  0x17   :  { %v34_v5 = vadd.f32 %v33_v4, %v24_v0  ;;  %v41_v7 = vstv %s121_s0  ;;  %v44_v10 = vstv %s174_s18  ;;  %s195_s30 = sld [smem:[#allocation2 + $0x14]]  ;;  %s198_s3 = sld [smem:[#allocation2 + $0x15]] }
  0x18   :  { %v30_v8 = vadd.f32 %v29_v2, %v28_v3  ;;  %v42_v9 = vadd.f32 %v41_v7, %v24_v0  ;;  %v49_v11 = vstv %s123_s20  ;;  %v52_v14 = vstv %s176_s19  ;;  %s201_s4 = sld [smem:[#allocation2 + $0x8]]  ;;  %s205_s5 = sld [smem:[#allocation2 + $0x9]] }
  0x19   :  { %v35_v12 = vand.u32 2147483647, %v34_v5  ;;  %v50_v13 = vadd.f32 %v49_v11, %v24_v0  ;;  %v57_v15 = vstv %s125_s22  ;;  %v60_v18 = vstv %s178_s21  ;;  %s134_s6 = sld [smem:[#allocation2 + $0xa]]  ;;  %s136_s7 = sld [smem:[#allocation2 + $0xb]] }
  0x1a   :  { %v43_v16 = vand.u32 2147483647, %v42_v9  ;;  %v58_v17 = vadd.f32 %v57_v15, %v24_v0  ;;  %v65_v19 = vstv %s127_s26  ;;  %v68_v26 = vstv %s183_s25 }
  0x1b   :  { %v37_v20 = vmul.f32 %v36_v6, %v35_v12  ;;  %v51_v21 = vand.u32 2147483647, %v50_v13  ;;  %v66_v22 = vadd.f32 %v65_v19, %v24_v0  ;;  %v73_v23 = vstv %s185_s27 }
  0x1c   :  { %v45_v24 = vmul.f32 %v44_v10, %v43_v16  ;;  %v59_v25 = vand.u32 2147483647, %v58_v17  ;;  %v74_v27 = vadd.f32 %v73_v23, %v24_v0  ;;  %v81_v31 = vstv %s187_s28 }
  0x1d   :  { %v38_v28 = vadd.f32 %v37_v20, %v30_v8  ;;  %v53_v29 = vmul.f32 %v52_v14, %v51_v21  ;;  %v67_v30 = vand.u32 2147483647, %v66_v22  ;;  %v82_v32 = vadd.f32 %v81_v31, %v24_v0 }
  0x1e   :  { %v61_v34 = vmul.f32 %v60_v18, %v59_v25  ;;  %v75_v35 = vand.u32 2147483647, %v74_v27  ;;  %v89_v36 = vstv %s190_s29  ;;  %v76_v38 = vstv %s193_s1 }
  0x1f   :  { %v46_v33 = vadd.f32 %v45_v24, %v38_v28  ;;  %v69_v37 = vmul.f32 %v68_v26, %v67_v30  ;;  %v90_v39 = vadd.f32 %v89_v36, %v24_v0  ;;  %v97_v40 = vstv %s195_s30 }
  0x20   :  { %v83_v42 = vand.u32 2147483647, %v82_v32  ;;  %v98_v43 = vadd.f32 %v97_v40, %v24_v0  ;;  %v105_v44 = vstv %s198_s3  ;;  %v84_v45 = vstv %s201_s4 }
  0x21   :  { %v54_v41 = vadd.f32 %v53_v29, %v46_v33  ;;  %v77_v47 = vmul.f32 %v76_v38, %v75_v35  ;;  %v91_v48 = vand.u32 2147483647, %v90_v39  ;;  %v106_v49 = vadd.f32 %v105_v44, %v24_v0 }
  0x22   :  { %v92_v50 = vstv %s205_s5  ;;  %v85_v52 = vmul.f32 %v84_v45, %v83_v42  ;;  %v99_v53 = vand.u32 2147483647, %v98_v43  ;;  %v100_v54 = vstv %s134_s6 }
  0x23   :  { %v62_v46 = vadd.f32 %v61_v34, %v54_v41  ;;  %v93_v56 = vmul.f32 %v92_v50, %v91_v48  ;;  %v107_v57 = vand.u32 2147483647, %v106_v49  ;;  %v108_v58 = vstv %s136_s7 }
  0x24   :  { %v101_v60 = vmul.f32 %v100_v54, %v99_v53 }
  0x25   :  { %v70_v51 = vadd.f32 %v69_v37, %v62_v46  ;;  %v109_v62 = vmul.f32 %v108_v58, %v107_v57 }
  0x27   :  { %v78_v55 = vadd.f32 %v77_v47, %v70_v51 }
  0x29   :  { %v86_v59 = vadd.f32 %v85_v52, %v78_v55 }
  0x2b   :  { %v94_v61 = vadd.f32 %v93_v56, %v86_v59 }
  0x2d   :  { %v102_v63 = vadd.f32 %v101_v60, %v94_v61 }
  0x2f   :  { %v110_v1 = vadd.f32 %v109_v62, %v102_v63 }
  0x31   :  { %111 = vst [vmem:[%s219_s2] sm:$0xff] %v110_v1 }
  0x32   :  { %116 = vsyncpa [#allocation3], 1 }

</bundles_post_ra>
